<compile_context>
chip_gen: v6e
topology: v6e:2x2x1
jax: 0.10.0
libtpu: 0.0.40
codegen_flags: <defaults>
</compile_context>

<pallas_src>
import functools

import jax
import jax.numpy as jnp
from jax.experimental import pallas as pl
from jax.experimental.pallas import tpu as pltpu

_VMEM_LIMIT = 48 * 1024 * 1024          # safe on v5e/v6e (128 MiB) and v7x (64 MiB/TC)
_LINEAR_TILE_BUDGET = 24 * 1024 * 1024  # double-buffered x/out tiles for the linears
_ATTN_VMEM_BUDGET = 20 * 1024 * 1024    # per-step attention working set


# ---------------------------------------------------------------------------
# Tiling heuristics
# ---------------------------------------------------------------------------
def _pick_tm(n, d_in, d_out):
    """Row tile for the linear layers: as big as the VMEM budget allows."""
    tm = 2048
    while tm > 64 and 2 * 4 * tm * (d_in + d_out) > _LINEAR_TILE_BUDGET:
        tm //= 2
    return n if n <= tm else tm          # boundary blocks are masked by Pallas


def _pick_kv_rows(h, w, s):
    """KV tile size in spatial rows (keeps rel-pos bias tiles aligned)."""
    if s <= 1024:
        return h                         # single KV tile
    for r in range(h, 0, -1):
        tk = r * w
        if h % r == 0 and tk <= 1024 and tk % 8 == 0:
            return r
    return h


def _pick_head_block(bnh, s, hd, tk):
    """Heads per attention grid step, bounded by a per-step VMEM estimate."""
    for g in range(min(bnh, 8), 0, -1):
        if bnh % g:
            continue
        est = 4 * g * (s * tk + 3 * s * hd + 4 * tk * hd)
        if est <= _ATTN_VMEM_BUDGET:
            return g
    return 1


# ---------------------------------------------------------------------------
# Linear:  y = x @ W + b   (W stored (in_features, out_features), bf16)
# ---------------------------------------------------------------------------
def _linear_kernel(x_ref, w_ref, b_ref, o_ref):
    x = x_ref[...].astype(jnp.bfloat16)                       # bf16 MXU inputs
    y = jnp.dot(x, w_ref[...], preferred_element_type=jnp.float32)
    o_ref[...] = (y + b_ref[...]).astype(o_ref.dtype)         # f32 bias + store


def _linear(x, w_bf16, b):
    n, d_in = x.shape
    d_out = w_bf16.shape[1]
    tm = _pick_tm(n, d_in, d_out)
    return pl.pallas_call(
        _linear_kernel,
        out_shape=jax.ShapeDtypeStruct((n, d_out), x.dtype),
        grid_spec=pltpu.PrefetchScalarGridSpec(
            num_scalar_prefetch=0,
            grid=(pl.cdiv(n, tm),),
            in_specs=[
                pl.BlockSpec((tm, d_in), lambda i: (i, 0)),
                pl.BlockSpec((d_in, d_out), lambda i: (0, 0)),   # resident weight
                pl.BlockSpec((1, d_out), lambda i: (0, 0)),      # resident bias
            ],
            out_specs=pl.BlockSpec((tm, d_out), lambda i: (i, 0)),
        ),
        compiler_params=pltpu.CompilerParams(
            dimension_semantics=("parallel",),
            vmem_limit_bytes=_VMEM_LIMIT,
        ),
    )(x, w_bf16, b)


# ---------------------------------------------------------------------------
# Fused flash-style attention core (G heads per step, KV tiled, online softmax)
# ---------------------------------------------------------------------------
def _attn_kernel(*refs, scale, has_bias):
    if has_bias:
        (q_ref, k_ref, v_ref, rh_ref, rw_ref, eh_ref, ew_ref,
         o_ref, m_sc, l_sc, acc_sc) = refs
    else:
        q_ref, k_ref, v_ref, o_ref, m_sc, l_sc, acc_sc = refs

    kv = pl.program_id(1)

    @pl.when(kv == 0)
    def _():
        m_sc[...] = jnp.full_like(m_sc, -jnp.inf)
        l_sc[...] = jnp.zeros_like(l_sc)
        acc_sc[...] = jnp.zeros_like(acc_sc)

    # (G, S, hd) x (G, tk, hd) -> (G, S, tk); bf16 MXU inputs, f32 accumulate.
    s = jnp.einsum("gqd,gkd->gqk", q_ref[...], k_ref[...],
                   preferred_element_type=jnp.float32) * scale

    if has_bias:
        # Decomposed rel-pos bias, expanded on the fly with tiny one-hot MXU
        # matmuls (no (S, S) bias in HBM, no in-kernel reshape):
        #   bias[g, q, r*W + w] = rel_h[g, q, r] + rel_w[g, q, w]
        rh = rh_ref[...][:, 0].astype(jnp.bfloat16)            # (G, S, rows)
        rw = rw_ref[...].astype(jnp.bfloat16)                  # (G, S, W)
        s = s + jnp.einsum("gqr,rk->gqk", rh, eh_ref[...],
                           preferred_element_type=jnp.float32)
        s = s + jnp.einsum("gqw,wk->gqk", rw, ew_ref[...],
                           preferred_element_type=jnp.float32)

    m_prev = m_sc[...]
    m_new = jnp.maximum(m_prev, jnp.max(s, axis=-1, keepdims=True))
    alpha = jnp.exp(m_prev - m_new)
    p = jnp.exp(s - m_new)
    l_sc[...] = alpha * l_sc[...] + jnp.sum(p, axis=-1, keepdims=True)
    acc_sc[...] = alpha * acc_sc[...] + jnp.einsum(
        "gqk,gkd->gqd", p.astype(v_ref.dtype), v_ref[...],
        preferred_element_type=jnp.float32)
    m_sc[...] = m_new

    @pl.when(kv == pl.num_programs(1) - 1)
    def _():
        # Normalize once after PV with an EUP reciprocal (softmax denominator).
        o_ref[...] = (acc_sc[...] * pl.reciprocal(l_sc[...], approx=True)
                      ).astype(o_ref.dtype)


def _attention(q, k, v, rel_h, rel_w, scale, h, w,
               head_block=None, kv_block_rows=None):
    bnh, s, hd = q.shape
    rows = kv_block_rows if kv_block_rows is not None else _pick_kv_rows(h, w, s)
    assert h % rows == 0, (h, rows)
    tk = rows * w
    if rows != h and tk % 8 != 0:        # layout fallback: single KV tile
        rows, tk = h, s
    n_kv = h // rows
    g = head_block if head_block is not None else _pick_head_block(bnh, s, hd, tk)
    assert bnh % g == 0, (bnh, g)

    has_bias = rel_h is not None
    kernel = functools.partial(_attn_kernel, scale=scale, has_bias=has_bias)

    in_specs = [
        pl.BlockSpec((g, s, hd), lambda i, t: (i, 0, 0)),
        pl.BlockSpec((g, tk, hd), lambda i, t: (i, t, 0)),
        pl.BlockSpec((g, tk, hd), lambda i, t: (i, t, 0)),
    ]
    args = [q, k, v]
    if has_bias:
        # (B*nH, S, k_h) -> (B*nH, n_kv, S, rows): KV-tile-major so each step
        # only DMAs its own rows of the height bias.
        rel_h_t = rel_h.reshape(bnh, s, n_kv, rows).transpose(0, 2, 1, 3)
        cols = jnp.arange(tk)
        e_h = (cols[None, :] // w == jnp.arange(rows)[:, None]).astype(jnp.bfloat16)
        e_w = (cols[None, :] % w == jnp.arange(w)[:, None]).astype(jnp.bfloat16)
        in_specs += [
            pl.BlockSpec((g, 1, s, rows), lambda i, t: (i, t, 0, 0)),
            pl.BlockSpec((g, s, w), lambda i, t: (i, 0, 0)),
            pl.BlockSpec((rows, tk), lambda i, t: (0, 0)),       # resident
            pl.BlockSpec((w, tk), lambda i, t: (0, 0)),          # resident
        ]
        args += [rel_h_t, rel_w, e_h, e_w]

    return pl.pallas_call(
        kernel,
        out_shape=jax.ShapeDtypeStruct((bnh, s, hd), jnp.float32),
        grid_spec=pltpu.PrefetchScalarGridSpec(
            num_scalar_prefetch=0,
            grid=(bnh // g, n_kv),
            in_specs=in_specs,
            out_specs=pl.BlockSpec((g, s, hd), lambda i, t: (i, 0, 0)),
            scratch_shapes=[
                pltpu.VMEM((g, s, 1), jnp.float32),    # running max
                pltpu.VMEM((g, s, 1), jnp.float32),    # running denom
                pltpu.VMEM((g, s, hd), jnp.float32),   # unnormalized accumulator
            ],
        ),
        compiler_params=pltpu.CompilerParams(
            dimension_semantics=("parallel", "arbitrary"),
            vmem_limit_bytes=_VMEM_LIMIT,
        ),
    )(*args)


# ---------------------------------------------------------------------------
# Relative position helpers (wrapper side: static gather + small einsums)
# ---------------------------------------------------------------------------
def _get_rel_pos(q_size, k_size, rel_pos):
    max_rel_dist = int(2 * max(q_size, k_size) - 1)
    # TODO(synk): F.interpolate(linear) resize path when rel_pos length differs.
    assert rel_pos.shape[0] == max_rel_dist, "rel_pos resize not implemented"
    q_coords = jnp.arange(q_size)[:, None] * max(k_size / q_size, 1.0)
    k_coords = jnp.arange(k_size)[None, :] * max(q_size / k_size, 1.0)
    relative_coords = (q_coords - k_coords) + (k_size - 1) * max(q_size / k_size, 1.0)
    return rel_pos[relative_coords.astype(jnp.int32)]        # (q_size, k_size, hd)


def _decomposed_rel_pos(q, rel_pos_h, rel_pos_w, q_size, k_size):
    """Returns rel_h (B*nH, S, k_h) and rel_w (B*nH, S, k_w) — NOT the S^2 bias."""
    q_h, q_w = q_size
    k_h, k_w = k_size
    rh = _get_rel_pos(q_h, k_h, rel_pos_h)
    rw = _get_rel_pos(q_w, k_w, rel_pos_w)
    b, _, hd = q.shape
    r_q = q.reshape(b, q_h, q_w, hd)
    rel_h = jnp.einsum("bhwc,hkc->bhwk", r_q, rh).reshape(b, q_h * q_w, k_h)
    rel_w = jnp.einsum("bhwc,wkc->bhwk", r_q, rw).reshape(b, q_h * q_w, k_w)
    return rel_h, rel_w


# ---------------------------------------------------------------------------
# Full forward (matches Attention.forward)
# ---------------------------------------------------------------------------
def attention_forward(x, params, num_heads, use_rel_pos=False,
                      rel_pos_h=None, rel_pos_w=None,
                      head_block=None, kv_block_rows=None):
    w_qkv, b_qkv, w_proj, b_proj = params
    B, H, W, C = x.shape
    head_dim = C // num_heads
    scale = head_dim ** (-0.5)
    S = H * W
    N = B * S

    w_qkv_bf = w_qkv.astype(jnp.bfloat16)
    w_proj_bf = w_proj.astype(jnp.bfloat16)

    # qkv projection (Pallas, bf16 MXU / f32 accumulate)
    qkv = _linear(x.reshape(N, C), w_qkv_bf, b_qkv)                    # (N, 3C) f32
    qkv = qkv.reshape(B, S, 3, num_heads, head_dim)
    qkv = jnp.transpose(qkv, (2, 0, 3, 1, 4)).reshape(3, B * num_heads, S, head_dim)
    q, k, v = qkv[0], qkv[1], qkv[2]
    # TODO(synk): read q/k/v head blocks straight from the (N, 3C) buffer and
    # write the attention output in (B, S, C) layout to drop these relayouts.

    rel_h = rel_w = None
    if use_rel_pos:
        rel_h, rel_w = _decomposed_rel_pos(q, rel_pos_h, rel_pos_w, (H, W), (H, W))

    # fused flash attention (Pallas): bf16 q/k/v inputs halve the DMA bytes
    out = _attention(q.astype(jnp.bfloat16), k.astype(jnp.bfloat16),
                     v.astype(jnp.bfloat16), rel_h, rel_w, scale, H, W,
                     head_block=head_block, kv_block_rows=kv_block_rows)

    out = out.reshape(B, num_heads, H, W, head_dim)
    out = jnp.transpose(out, (0, 2, 3, 1, 4)).reshape(N, C)

    # output projection (Pallas)
    out = _linear(out, w_proj_bf, b_proj)                              # (N, C)
    return out.reshape(B, H, W, C)


# ---------------------------------------------------------------------------
# Pure-JAX reference (mirrors the PyTorch module, f32 throughout)
# ---------------------------------------------------------------------------
def attention_reference(x, params, num_heads, use_rel_pos=False,
                        rel_pos_h=None, rel_pos_w=None):
    w_qkv, b_qkv, w_proj, b_proj = params
    B, H, W, C = x.shape
    head_dim = C // num_heads
    scale = head_dim ** (-0.5)
    S = H * W

    qkv = jnp.dot(x.reshape(-1, C), w_qkv) + b_qkv[0]
    qkv = qkv.reshape(B, S, 3, num_heads, head_dim)
    qkv = jnp.transpose(qkv, (2, 0, 3, 1, 4)).reshape(3, B * num_heads, S, head_dim)
    q, k, v = qkv[0], qkv[1], qkv[2]

    attn = (q * scale) @ jnp.swapaxes(k, -2, -1)
    if use_rel_pos:
        rel_h, rel_w = _decomposed_rel_pos(q, rel_pos_h, rel_pos_w, (H, W), (H, W))
        attn = attn + (rel_h[:, :, :, None] + rel_w[:, :, None, :]
                       ).reshape(q.shape[0], S, S)
    attn = jax.nn.softmax(attn, axis=-1)
    out = attn @ v
    out = out.reshape(B, num_heads, H, W, head_dim)
    out = jnp.transpose(out, (0, 2, 3, 1, 4)).reshape(-1, C)
    out = jnp.dot(out, w_proj) + b_proj[0]
    return out.reshape(B, H, W, C)


if __name__ == "__main__":
    # Small shapes consistent with the module: dim=64, 4 heads (head_dim=16),
    # x of (B=2, H=8, W=8, dim), rel-pos tables (2*8-1, 16).
    B, H, W = 2, 8, 8
    dim, num_heads = 64, 4
    head_dim = dim // num_heads

    key = jax.random.PRNGKey(0)
    kx, kqw, kqb, kpw, kpb, krh, krw = jax.random.split(key, 7)
    x = jax.random.normal(kx, (B, H, W, dim), jnp.float32)

    bound = 1.0 / (dim ** 0.5)  # nn.Linear default init scale
    w_qkv = jax.random.uniform(kqw, (dim, 3 * dim), jnp.float32, -bound, bound)
    b_qkv = jax.random.uniform(kqb, (1, 3 * dim), jnp.float32, -bound, bound)
    w_proj = jax.random.uniform(kpw, (dim, dim), jnp.float32, -bound, bound)
    b_proj = jax.random.uniform(kpb, (1, dim), jnp.float32, -bound, bound)
    # rel_pos params are zero-init in the module; small random values here so
    # the rel-pos math is actually exercised by the checks.
    rel_pos_h = 0.1 * jax.random.normal(krh, (2 * H - 1, head_dim), jnp.float32)
    rel_pos_w = 0.1 * jax.random.normal(krw, (2 * W - 1, head_dim), jnp.float32)

    params = (w_qkv, b_qkv, w_proj, b_proj)

    # bf16 MXU inputs + approx reciprocal => slightly looser tolerance than a
    # pure-f32 comparison; real bugs are O(0.1-1) off, so this still catches them.
    tol = dict(atol=3e-2, rtol=3e-2)

    ref_rel = attention_reference(x, params, num_heads, use_rel_pos=True,
                                  rel_pos_h=rel_pos_h, rel_pos_w=rel_pos_w)
    ref_plain = attention_reference(x, params, num_heads, use_rel_pos=False)

    # 1) rel-pos path forcing the flash KV tiling (2 KV tiles) and multiple
    #    head-group grid steps (G=2): exercises both grid axes + online softmax.
    out1 = attention_forward(x, params, num_heads, use_rel_pos=True,
                             rel_pos_h=rel_pos_h, rel_pos_w=rel_pos_w,
                             head_block=2, kv_block_rows=4)
    out1 = jax.block_until_ready(out1)
    assert out1.shape == (B, H, W, dim), out1.shape
    assert jnp.allclose(out1, ref_rel, **tol), "rel-pos flash path mismatch"

    # 2) rel-pos path with auto tiling (single KV tile, all heads per step).
    out2 = attention_forward(x, params, num_heads, use_rel_pos=True,
                             rel_pos_h=rel_pos_h, rel_pos_w=rel_pos_w)
    out2 = jax.block_until_ready(out2)
    assert jnp.allclose(out2, ref_rel, **tol), "rel-pos auto path mismatch"

    # 3) plain path (module default), auto tiling.
    out3 = attention_forward(x, params, num_heads, use_rel_pos=False)
    out3 = jax.block_until_ready(out3)
    assert jnp.allclose(out3, ref_plain, **tol), "plain path mismatch"

    print("KERNEL_OK")
</pallas_src>

<mosaic_0001>
module attributes {stable_mosaic.version = 11 : i64} {
  func.func @_linear_kernel(%arg0: i32, %arg1: memref<128x64xf32, #tpu.memory_space<vmem>>, %arg2: memref<64x192xbf16, #tpu.memory_space<vmem>>, %arg3: memref<1x192xf32, #tpu.memory_space<vmem>>, %arg4: memref<128x192xf32, #tpu.memory_space<vmem>>) attributes {dimension_semantics = [#tpu.dimension_semantics<parallel>], iteration_bounds = array<i64: 1>, scalar_prefetch = 0 : i64, scratch_operands = 0 : i64, tpu.core_type = #tpu.core_type<tc>, window_params = [{transform_indices = @transform_0, window_bounds = array<i64: 128, 64>}, {pipeline_mode = #tpu.pipeline_mode<synchronous>, transform_indices = @transform_1, window_bounds = array<i64: 64, 192>}, {pipeline_mode = #tpu.pipeline_mode<synchronous>, transform_indices = @transform_2, window_bounds = array<i64: 1, 192>}, {transform_indices = @transform_3, window_bounds = array<i64: 128, 192>}]} {
    %c0 = arith.constant 0 : index
    %c0_0 = arith.constant 0 : index
    %0 = vector.load %arg1[%c0, %c0_0] : memref<128x64xf32, #tpu.memory_space<vmem>>, vector<128x64xf32>
    %1 = arith.truncf %0 : vector<128x64xf32> to vector<128x64xbf16>
    %c0_1 = arith.constant 0 : index
    %c0_2 = arith.constant 0 : index
    %2 = vector.load %arg2[%c0_1, %c0_2] : memref<64x192xbf16, #tpu.memory_space<vmem>>, vector<64x192xbf16>
    %cst = arith.constant dense<0.000000e+00> : vector<128x192xf32>
    %3 = tpu.matmul %1, %2, %cst {dimension_numbers = #tpu.dot_dimension_numbers<[1], [0], [0], [1], [0, 0, 1, 1], [], []>} : vector<128x64xbf16>, vector<64x192xbf16>, vector<128x192xf32> -> vector<128x192xf32>
    %c0_3 = arith.constant 0 : index
    %c0_4 = arith.constant 0 : index
    %4 = vector.load %arg3[%c0_3, %c0_4] : memref<1x192xf32, #tpu.memory_space<vmem>>, vector<1x192xf32>
    %5 = vector.broadcast %4 : vector<1x192xf32> to vector<128x192xf32>
    %6 = arith.addf %3, %5 : vector<128x192xf32>
    %c0_5 = arith.constant 0 : index
    %c0_6 = arith.constant 0 : index
    %7 = vector.load %arg4[%c0_5, %c0_6] : memref<128x192xf32, #tpu.memory_space<vmem>>, vector<128x192xf32>
    tpu.vector_store %arg4[%c0_5, %c0_6], %6 {strides = array<i32>} : memref<128x192xf32, #tpu.memory_space<vmem>>, vector<128x192xf32>,
    return
  }
  func.func @transform_0(%arg0: i32) -> (i32, i32) {
    %c0_i32 = arith.constant 0 : i32
    %c0_i32_0 = arith.constant 0 : i32
    return %arg0, %c0_i32 : i32, i32
  }
  func.func @transform_1(%arg0: i32) -> (i32, i32) {
    %c0_i32 = arith.constant 0 : i32
    %c0_i32_0 = arith.constant 0 : i32
    %c0_i32_1 = arith.constant 0 : i32
    return %c0_i32, %c0_i32_0 : i32, i32
  }
  func.func @transform_2(%arg0: i32) -> (i32, i32) {
    %c0_i32 = arith.constant 0 : i32
    %c0_i32_0 = arith.constant 0 : i32
    %c0_i32_1 = arith.constant 0 : i32
    return %c0_i32, %c0_i32_0 : i32, i32
  }
  func.func @transform_3(%arg0: i32) -> (i32, i32) {
    %c0_i32 = arith.constant 0 : i32
    %c0_i32_0 = arith.constant 0 : i32
    return %arg0, %c0_i32 : i32, i32
  }
}

</mosaic_0001>

<bundles_post_ra>
// kernel: tpu_custom_call.1
= control target key start
LH: loop header
LB: loop body
LE: loop exit
PB: predicated region body
PF: predicated region fallthrough
CT: control target
= control target key end

     0   :  { %v310_v1 = vmov 0   ;;  %vm99_vm0 = vcmask 523264   ;;  %v49_v33 = vlaneseq  ;;  %s562_s1 = inlined_call_operand.vmem [shape: bf16[64,192], index: 1, kind: input, shape index: {}]   ;;  %s563_s0 = inlined_call_operand.vmem [shape: f32[128,64], index: 0, kind: input, shape index: {}]   ;;  %s564_s2 = inlined_call_operand.vmem [shape: f32[1,192], index: 2, kind: input, shape index: {}]   ;;  %s565_s3 = inlined_call_operand.vmem [shape: f32[128,192], index: 3, kind: output, shape index: {}]  }
   0x1   :  { %v298_v0 = vld [vmem:[%s562_s1 + $0x34] ss:$8 sps:$4 sm:$0xff]   ;;  %156 = vmatprep.mubr.bf16.mxu0 %v310_v1  ;;  %196 = vmatprep.mubr.bf16.mxu1 %v310_v1  ;;  %v300_v2 = vld [vmem:[%s562_s1 + $0x30] ss:$8 sps:$4 sm:$0xff]   ;;  %v301_v3 = vld [vmem:[%s562_s1 + $0x24] ss:$8 sps:$4 sm:$0xff]  }
   0x2   :  { %132 = vmatprep.subr.bf16.mxu0 %v298_v0  ;;  %289 = vmatprep.subr.bf16.mxu1 %v298_v0  ;;  %v303_v4 = vld [vmem:[%s562_s1 + $0x20] ss:$8 sps:$4 sm:$0xff]   ;;  %v304_v5 = vld [vmem:[%s562_s1 + $0x14] ss:$8 sps:$4 sm:$0xff]   ;;  %v306_v6 = vld [vmem:[%s562_s1 + $0x10] ss:$8 sps:$4 sm:$0xff]  }
   0x3   :  { %133 = vmatpush1.bf16.msra.mxu0 %v300_v2  ;;  %293 = vmatpush1.bf16.msra.mxu1 %v300_v2  ;;  %v307_v7 = vld [vmem:[%s562_s1 + $0x4] ss:$8 sps:$4 sm:$0xff]   ;;  %v309_v8 = vld [vmem:[%s562_s1] ss:$8 sps:$4 sm:$0xff]   ;;  %v17_v15 = vld [vmem:[%s563_s0 + $0x10] sm:$0xff]  ;;  %v50_v34 = vshrl.u32 %v49_v33, 7 }
   0x4   :  { %134 = vmatprep.subr.bf16.mxu0 %v301_v3  ;;  %290 = vmatprep.subr.bf16.mxu1 %v301_v3  ;;  %v15_v9 = vld [vmem:[%s563_s0] sm:$0xff]  ;;  %v16_v10 = vld [vmem:[%s563_s0 + $0x8] sm:$0xff]  ;;  %v18_v16 = vld [vmem:[%s563_s0 + $0x18] sm:$0xff] }
   0x5   :  { %v23_v11 = vld [vmem:[%s563_s0 + $0x40] sm:$0xff]  ;;  %v24_v12 = vld [vmem:[%s563_s0 + $0x48] sm:$0xff]  ;;  %v31_v13 = vpack.c.bf16 %v16_v10, %v15_v9  ;;  %v25_v17 = vld [vmem:[%s563_s0 + $0x50] sm:$0xff]  ;;  %v32_v19 = vpack.c.bf16 %v18_v16, %v17_v15  ;;  %v51_v35 = vsub.s32 0, %v50_v34  ;;  %v55_v37 = vsub.s32 1, %v50_v34 }
   0x6   :  { %v35_v14 = vpack.c.bf16 %v24_v12, %v23_v11  ;;  %v26_v18 = vld [vmem:[%s563_s0 + $0x58] sm:$0xff]  ;;  %v19_v21 = vld [vmem:[%s563_s0 + $0x20] sm:$0xff]  ;;  %v20_v22 = vld [vmem:[%s563_s0 + $0x28] sm:$0xff] }
   0x7   :  { %135 = vmatpush1.bf16.msra.mxu0 %v303_v4  ;;  %294 = vmatpush1.bf16.msra.mxu1 %v303_v4  ;;  %v36_v20 = vpack.c.bf16 %v26_v18, %v25_v17  ;;  %v27_v23 = vld [vmem:[%s563_s0 + $0x60] sm:$0xff]  ;;  %v28_v24 = vld [vmem:[%s563_s0 + $0x68] sm:$0xff]  ;;  %v33_v25 = vpack.c.bf16 %v20_v22, %v19_v21  ;;  %v21_v27 = vld [vmem:[%s563_s0 + $0x30] sm:$0xff] }
   0x8   :  { %136 = vmatprep.subr.bf16.mxu0 %v304_v5  ;;  %291 = vmatprep.subr.bf16.mxu1 %v304_v5  ;;  %v37_v26 = vpack.c.bf16 %v28_v24, %v27_v23  ;;  %v22_v28 = vld [vmem:[%s563_s0 + $0x38] sm:$0xff]  ;;  %v29_v29 = vld [vmem:[%s563_s0 + $0x70] sm:$0xff]  ;;  %v47_v36 = vld [vmem:[%s564_s2] sm:$0x3] }
   0x9   :  { %v30_v30 = vld [vmem:[%s563_s0 + $0x78] sm:$0xff]  ;;  %v34_v31 = vpack.c.bf16 %v22_v28, %v21_v27  ;;  %v414_v38 = vrot.slane %v47_v36, %v51_v35  ;;  %v416_v39 = vrot.slane %v47_v36, %v55_v37 }
   0xa   :  { %v38_v32 = vpack.c.bf16 %v30_v30, %v29_v29 }
   0xb   :  { %137 = vmatpush1.bf16.msra.mxu0 %v306_v6  ;;  %295 = vmatpush1.bf16.msra.mxu1 %v306_v6 }
   0xc   :  { %138 = vmatprep.subr.bf16.mxu0 %v307_v7  ;;  %292 = vmatprep.subr.bf16.mxu1 %v307_v7 }
   0xf   :  { %139 = vmatpush1.bf16.msra.mxu0 %v309_v8  ;;  %296 = vmatpush1.bf16.msra.mxu1 %v309_v8 }
  0x12   :  { %281 = vmatmul.mubr.msk.bf16.vlgmr.msra.gmra.mxu0 %vm99_vm0, %v31_v13  ;;  %285 = vmatmul.mubr.msk.bf16.vlgmr.msra.gmra.mxu1 %vm99_vm0, %v35_v14 }
  0x13   :  { %166 = vmatprep.mubr.bf16.mxu0 %v310_v1  ;;  %206 = vmatprep.mubr.bf16.mxu1 %v310_v1 }
  0x1a   :  { %282 = vmatmul.mubr.msk.bf16.gmra.mxu0 %vm99_vm0, %v32_v19  ;;  %286 = vmatmul.mubr.msk.bf16.gmra.mxu1 %vm99_vm0, %v36_v20 }
  0x1b   :  { %176 = vmatprep.mubr.bf16.mxu0 %v310_v1  ;;  %216 = vmatprep.mubr.bf16.mxu1 %v310_v1 }
  0x22   :  { %283 = vmatmul.mubr.msk.bf16.gmra.mxu0 %vm99_vm0, %v33_v25  ;;  %287 = vmatmul.mubr.msk.bf16.gmra.mxu1 %vm99_vm0, %v37_v26 }
  0x23   :  { %186 = vmatprep.mubr.bf16.mxu0 %v310_v1  ;;  %226 = vmatprep.mubr.bf16.mxu1 %v310_v1 }
  0x2a   :  { %284 = vmatmul.mubr.msk.bf16.gmra.mxu0 %vm99_vm0, %v34_v31  ;;  %288 = vmatmul.mubr.msk.bf16.gmra.mxu1 %vm99_vm0, %v38_v32 }
  0xd2   :  { %v158_v40 = vpop.f32.mrf.mxu0  ;;  %v198_v41 = vpop.f32.mrf.mxu1 }
  0xd3   :  { %v159_v42 = vadd.f32 %v158_v40, %v414_v38  ;;  %v199_v43 = vadd.f32 %v198_v41, %v414_v38 }
  0xd4   :  { %v160_v44 = vpop.f32.mrf.mxu0  ;;  %v200_v45 = vpop.f32.mrf.mxu1 }
  0xd5   :  { %237 = vst [vmem:[%s565_s3] sm:$0xff] %v159_v42  ;;  %253 = vst [vmem:[%s565_s3 + $0x80] sm:$0xff] %v199_v43  ;;  %v161_v46 = vadd.f32 %v160_v44, %v416_v39  ;;  %v201_v47 = vadd.f32 %v200_v45, %v416_v39 }
  0xd6   :  { %v162_v48 = vpop.f32.mrf.mxu0  ;;  %v202_v49 = vpop.f32.mrf.mxu1 }
  0xd7   :  { %238 = vst.msk [vmem:[%s565_s3 + $0x8] sm:$0xff] %vm99_vm0, %v161_v46  ;;  %254 = vst.msk [vmem:[%s565_s3 + $0x88] sm:$0xff] %vm99_vm0, %v201_v47  ;;  %v163_v50 = vadd.f32 %v162_v48, %v414_v38  ;;  %v203_v51 = vadd.f32 %v202_v49, %v414_v38 }
  0xd8   :  { %v164_v52 = vpop.f32.mrf.mxu0  ;;  %v204_v53 = vpop.f32.mrf.mxu1 }
  0xd9   :  { %239 = vst [vmem:[%s565_s3 + $0x10] sm:$0xff] %v163_v50  ;;  %255 = vst [vmem:[%s565_s3 + $0x90] sm:$0xff] %v203_v51  ;;  %v165_v54 = vadd.f32 %v164_v52, %v416_v39  ;;  %v205_v55 = vadd.f32 %v204_v53, %v416_v39 }
  0xda   :  { %v168_v56 = vpop.f32.mrf.mxu0  ;;  %v208_v57 = vpop.f32.mrf.mxu1 }
  0xdb   :  { %240 = vst.msk [vmem:[%s565_s3 + $0x18] sm:$0xff] %vm99_vm0, %v165_v54  ;;  %256 = vst.msk [vmem:[%s565_s3 + $0x98] sm:$0xff] %vm99_vm0, %v205_v55  ;;  %v169_v58 = vadd.f32 %v168_v56, %v414_v38  ;;  %v209_v59 = vadd.f32 %v208_v57, %v414_v38 }
  0xdc   :  { %v170_v60 = vpop.f32.mrf.mxu0  ;;  %v210_v61 = vpop.f32.mrf.mxu1 }
  0xdd   :  { %241 = vst [vmem:[%s565_s3 + $0x20] sm:$0xff] %v169_v58  ;;  %257 = vst [vmem:[%s565_s3 + $0xa0] sm:$0xff] %v209_v59  ;;  %v171_v62 = vadd.f32 %v170_v60, %v416_v39  ;;  %v211_v63 = vadd.f32 %v210_v61, %v416_v39 }
  0xde   :  { %v172_v0 = vpop.f32.mrf.mxu0  ;;  %v212_v1 = vpop.f32.mrf.mxu1 }
  0xdf   :  { %242 = vst.msk [vmem:[%s565_s3 + $0x28] sm:$0xff] %vm99_vm0, %v171_v62  ;;  %258 = vst.msk [vmem:[%s565_s3 + $0xa8] sm:$0xff] %vm99_vm0, %v211_v63  ;;  %v173_v2 = vadd.f32 %v172_v0, %v414_v38  ;;  %v213_v3 = vadd.f32 %v212_v1, %v414_v38 }
  0xe0   :  { %v174_v4 = vpop.f32.mrf.mxu0  ;;  %v214_v5 = vpop.f32.mrf.mxu1 }
  0xe1   :  { %243 = vst [vmem:[%s565_s3 + $0x30] sm:$0xff] %v173_v2  ;;  %259 = vst [vmem:[%s565_s3 + $0xb0] sm:$0xff] %v213_v3  ;;  %v175_v6 = vadd.f32 %v174_v4, %v416_v39  ;;  %v215_v7 = vadd.f32 %v214_v5, %v416_v39 }
  0xe2   :  { %v178_v8 = vpop.f32.mrf.mxu0  ;;  %v218_v9 = vpop.f32.mrf.mxu1 }
  0xe3   :  { %244 = vst.msk [vmem:[%s565_s3 + $0x38] sm:$0xff] %vm99_vm0, %v175_v6  ;;  %260 = vst.msk [vmem:[%s565_s3 + $0xb8] sm:$0xff] %vm99_vm0, %v215_v7  ;;  %v179_v10 = vadd.f32 %v178_v8, %v414_v38  ;;  %v219_v11 = vadd.f32 %v218_v9, %v414_v38 }
  0xe4   :  { %v180_v12 = vpop.f32.mrf.mxu0  ;;  %v220_v13 = vpop.f32.mrf.mxu1 }
  0xe5   :  { %245 = vst [vmem:[%s565_s3 + $0x40] sm:$0xff] %v179_v10  ;;  %261 = vst [vmem:[%s565_s3 + $0xc0] sm:$0xff] %v219_v11  ;;  %v181_v14 = vadd.f32 %v180_v12, %v416_v39  ;;  %v221_v15 = vadd.f32 %v220_v13, %v416_v39 }
  0xe6   :  { %v182_v16 = vpop.f32.mrf.mxu0  ;;  %v222_v17 = vpop.f32.mrf.mxu1 }
  0xe7   :  { %246 = vst.msk [vmem:[%s565_s3 + $0x48] sm:$0xff] %vm99_vm0, %v181_v14  ;;  %262 = vst.msk [vmem:[%s565_s3 + $0xc8] sm:$0xff] %vm99_vm0, %v221_v15  ;;  %v183_v18 = vadd.f32 %v182_v16, %v414_v38  ;;  %v223_v19 = vadd.f32 %v222_v17, %v414_v38 }
  0xe8   :  { %v184_v20 = vpop.f32.mrf.mxu0  ;;  %v224_v21 = vpop.f32.mrf.mxu1 }
  0xe9   :  { %247 = vst [vmem:[%s565_s3 + $0x50] sm:$0xff] %v183_v18  ;;  %263 = vst [vmem:[%s565_s3 + $0xd0] sm:$0xff] %v223_v19  ;;  %v185_v22 = vadd.f32 %v184_v20, %v416_v39  ;;  %v225_v23 = vadd.f32 %v224_v21, %v416_v39 }
  0xea   :  { %v188_v24 = vpop.f32.mrf.mxu0  ;;  %v228_v25 = vpop.f32.mrf.mxu1 }
  0xeb   :  { %248 = vst.msk [vmem:[%s565_s3 + $0x58] sm:$0xff] %vm99_vm0, %v185_v22  ;;  %264 = vst.msk [vmem:[%s565_s3 + $0xd8] sm:$0xff] %vm99_vm0, %v225_v23  ;;  %v189_v26 = vadd.f32 %v188_v24, %v414_v38  ;;  %v229_v27 = vadd.f32 %v228_v25, %v414_v38 }
  0xec   :  { %v190_v28 = vpop.f32.mrf.mxu0  ;;  %v230_v29 = vpop.f32.mrf.mxu1 }
  0xed   :  { %249 = vst [vmem:[%s565_s3 + $0x60] sm:$0xff] %v189_v26  ;;  %265 = vst [vmem:[%s565_s3 + $0xe0] sm:$0xff] %v229_v27  ;;  %v191_v30 = vadd.f32 %v190_v28, %v416_v39  ;;  %v231_v31 = vadd.f32 %v230_v29, %v416_v39 }
  0xee   :  { %v192_v32 = vpop.f32.mrf.mxu0  ;;  %v232_v33 = vpop.f32.mrf.mxu1 }
  0xef   :  { %250 = vst.msk [vmem:[%s565_s3 + $0x68] sm:$0xff] %vm99_vm0, %v191_v30  ;;  %266 = vst.msk [vmem:[%s565_s3 + $0xe8] sm:$0xff] %vm99_vm0, %v231_v31  ;;  %v193_v34 = vadd.f32 %v192_v32, %v414_v38  ;;  %v233_v35 = vadd.f32 %v232_v33, %v414_v38 }
  0xf0   :  { %v194_v36 = vpop.f32.mrf.mxu0  ;;  %v234_v37 = vpop.f32.mrf.mxu1 }
  0xf1   :  { %251 = vst [vmem:[%s565_s3 + $0x70] sm:$0xff] %v193_v34  ;;  %267 = vst [vmem:[%s565_s3 + $0xf0] sm:$0xff] %v233_v35  ;;  %v195_v40 = vadd.f32 %v194_v36, %v416_v39  ;;  %v235_v41 = vadd.f32 %v234_v37, %v416_v39 }
  0xf3   :  { %252 = vst.msk [vmem:[%s565_s3 + $0x78] sm:$0xff] %vm99_vm0, %v195_v40  ;;  %268 = vst.msk [vmem:[%s565_s3 + $0xf8] sm:$0xff] %vm99_vm0, %v235_v41 }

</bundles_post_ra>
